<compile_context>
chip_gen: v7x
topology: tpu7x:2x2x1
jax: 0.10.0
libtpu: 0.0.40
codegen_flags: <defaults>
</compile_context>

<pallas_src>
import functools

import jax
import jax.numpy as jnp
from jax import lax
from jax.experimental import pallas as pl
from jax.experimental.pallas import tpu as pltpu


# ------------------------------ fused kernel --------------------------------

def _fused_forward_kernel(a_ref, xs_ref, p_ref, hi_ref, h_ref, loss_ref, *,
                          n, fin, latent, temperature):
    f32 = jnp.float32

    a = a_ref[...]                      # [3N, 3N] blockdiag(a_s, a_sf, a_s)
    xs = xs_ref[...]                    # [3N, Fin] rows = [x ; x_p ; n_x]

    # --- unpack the parameter slab (static, sublane-aligned slices) ---
    r = 2 * fin
    w_enc = p_ref[0:fin, 0:latent]      # [Fin, L]
    w_dect = p_ref[fin:r, 0:latent]     # [Fin, L]  (= w_dec.T)
    vecs = p_ref[r:r + 4, :]            # [4, W]  rows: b_enc, gamma, beta, b_dec
    b_enc = vecs[0:1, 0:latent]
    gamma = vecs[1:2, 0:latent]
    beta = vecs[2:3, 0:latent]
    b_dec = vecs[3:4, 0:fin]

    # --- encoder: shared-weight matmul + ONE block-diag GCN propagation ---
    # TODO(synk): at large N cast a/xs to bf16 for the MXU (keep f32 accum) and
    # switch to a tiled / scalar-prefetch sparse path before VMEM overflows
    # (v7x: 64 MiB physical, 32 MiB default scoped).
    xw = jnp.dot(xs, w_enc, preferred_element_type=f32)        # [3N, L]
    he = jnp.dot(a, xw, preferred_element_type=f32) + b_enc    # [3N, L]
    hi = he[0:n]            # encoder(x,   a_s)
    h1p = he[n:2 * n]       # encoder(x_p, a_sf)
    h2p = he[2 * n:3 * n]   # encoder(n_x, a_s)

    # --- decoder on hi (uses only the a_s block of the big adjacency) ---
    a_s = a[0:n, 0:n]
    hw = lax.dot_general(hi, w_dect, (((1,), (1,)), ((), ())),
                         preferred_element_type=f32)           # [N, Fin]
    h = jnp.dot(a_s, hw, preferred_element_type=f32) + b_dec

    # --- BatchNorm1d (training-mode per-call stats, biased var) + ELU(1) ---
    # Lane-pack the three [N,L] tensors into one [N,3L] so BN stats / affine /
    # ELU run once; per-column stats keep per-tensor BatchNorm semantics.
    hb = jnp.concatenate([hi, h1p, h2p], axis=1)               # [N, 3L]
    g3 = jnp.concatenate([gamma, gamma, gamma], axis=1)        # [1, 3L]
    b3 = jnp.concatenate([beta, beta, beta], axis=1)           # [1, 3L]
    inv_rows = 1.0 / n
    mean = jnp.sum(hb, axis=0, keepdims=True) * inv_rows
    ex2 = jnp.sum(hb * hb, axis=0, keepdims=True) * inv_rows
    var = ex2 - mean * mean
    scale = lax.rsqrt(var + 1e-5) * g3                         # folded affine
    shift = b3 - mean * scale
    y = hb * scale + shift
    yb = jnp.where(y > 0, y, jnp.exp(jnp.minimum(y, 0.0)) - 1.0)   # ELU(1)
    h0 = yb[:, 0:latent]
    h1 = yb[:, latent:2 * latent]
    h2 = yb[:, 2 * latent:3 * latent]

    # --- loss: MSE(x, h) + InfoNCE(h0; pos=h1; neg=h2), unpaired, labels=0 ---
    x = xs[0:n]
    diff = x - h
    mse = jnp.sum(diff * diff) * (1.0 / (n * fin))

    def l2norm(v):
        ss = jnp.sum(v * v, axis=-1, keepdims=True)
        return v * lax.rsqrt(jnp.maximum(ss, 1e-24))   # == v / max(||v||,1e-12)

    q = l2norm(h0)
    pk = l2norm(h1)
    nk = l2norm(h2)
    inv_t = 1.0 / temperature
    pos = jnp.sum(q * pk, axis=-1, keepdims=True) * inv_t          # [N, 1]
    neg = lax.dot_general(q, nk, (((1,), (1,)), ((), ())),
                          preferred_element_type=f32) * inv_t      # [N, N]
    # TODO(synk): at large N replace the materialized [N,N] logits with an
    # online (flash-style) max/logsumexp over tiles of nk.
    m = jnp.maximum(pos, jnp.max(neg, axis=-1, keepdims=True))
    lse = m + jnp.log(jnp.exp(pos - m)
                      + jnp.sum(jnp.exp(neg - m), axis=-1, keepdims=True))
    ce = jnp.sum(lse - pos) * (1.0 / n)

    hi_ref[...] = hi
    h_ref[...] = h
    loss_ref[0] = mse + ce


# ------------------------------- JAX glue -----------------------------------

def build_a_hat(edge_index, num_nodes):
    """Dense GCN-normalized adjacency, improved=True self-loops (weight 2).

    Built as a one-hot [N,E]@[E,N] matmul (fused MXU op) instead of a scatter.
    """
    src, dst = edge_index[0], edge_index[1]
    oh_dst = jax.nn.one_hot(dst, num_nodes, dtype=jnp.float32)   # [E, N]
    oh_src = jax.nn.one_hot(src, num_nodes, dtype=jnp.float32)   # [E, N]
    a = jnp.dot(oh_dst.T, oh_src)                                # a[dst, src] += 1
    a = a + 2.0 * jnp.eye(num_nodes, dtype=jnp.float32)
    deg = jnp.sum(a, axis=1)
    dinv = jnp.where(deg > 0, lax.rsqrt(deg), 0.0)
    return a * dinv[:, None] * dinv[None, :]


def block_diag3(a, b, c):
    n = a.shape[0]
    z = jnp.zeros((n, n), a.dtype)
    return jnp.block([[a, z, z], [z, b, z], [z, z, c]])


def glorot(key, fan_in, fan_out):
    lim = jnp.sqrt(6.0 / (fan_in + fan_out))
    return jax.random.uniform(key, (fan_in, fan_out), jnp.float32, -lim, lim)


def init_params(key, in_dim, latent_dim):
    k1, k2 = jax.random.split(key)
    return {
        "w_enc": glorot(k1, in_dim, latent_dim),
        "b_enc": jnp.zeros((latent_dim,), jnp.float32),
        "w_dec": glorot(k2, latent_dim, in_dim),
        "b_dec": jnp.zeros((in_dim,), jnp.float32),
        "bn_gamma": jnp.ones((latent_dim,), jnp.float32),
        "bn_beta": jnp.zeros((latent_dim,), jnp.float32),
    }


def pack_params(params, in_dim, latent):
    """One [2*Fin+4, max(L,Fin)] slab: w_enc | w_dec^T | b_enc | gamma | beta | b_dec."""
    w = max(latent, in_dim)

    def row(v):
        v = v.reshape(1, -1) if v.ndim == 1 else v
        return jnp.pad(v, ((0, 0), (0, w - v.shape[1])))

    return jnp.concatenate([
        row(params["w_enc"]),       # [Fin, W]
        row(params["w_dec"].T),     # [Fin, W]
        row(params["b_enc"]),       # [1, W]
        row(params["bn_gamma"]),    # [1, W]
        row(params["bn_beta"]),     # [1, W]
        row(params["b_dec"]),       # [1, W]
    ], axis=0)


def model_forward(params, x, n_x, s_edge_index, sf_edge_index, mask_key):
    n, in_dim = x.shape
    latent = params["w_enc"].shape[1]

    a_s = build_a_hat(s_edge_index, n)
    a_sf = build_a_hat(sf_edge_index, n)
    # encoder(x, a_s), encoder(x_p, a_sf), encoder(n_x, a_s) as ONE propagation
    a_big = block_diag3(a_s, a_sf, a_s)                           # [3N, 3N]

    # mask_feature(x, p=0.2), mode='col': drop whole feature columns w.p. 0.2
    col_mask = (jax.random.uniform(mask_key, (1, in_dim)) >= 0.2).astype(x.dtype)
    xs = jnp.concatenate([x, x * col_mask, n_x], axis=0)          # [3N, Fin]

    p_slab = pack_params(params, in_dim, latent)

    # TODO(synk): for a batch of graphs, add a leading 'parallel' grid axis so
    # v7x shards the batch across both TensorCores.
    kernel = functools.partial(_fused_forward_kernel, n=n, fin=in_dim,
                               latent=latent, temperature=0.05)
    hi, h, loss = pl.pallas_call(
        kernel,
        out_shape=(
            jax.ShapeDtypeStruct((n, latent), jnp.float32),
            jax.ShapeDtypeStruct((n, in_dim), jnp.float32),
            jax.ShapeDtypeStruct((1,), jnp.float32),
        ),
        out_specs=(
            pl.BlockSpec(memory_space=pltpu.MemorySpace.VMEM),
            pl.BlockSpec(memory_space=pltpu.MemorySpace.VMEM),
            pl.BlockSpec(memory_space=pltpu.MemorySpace.SMEM),
        ),
    )(a_big, xs, p_slab)
    return hi, h, loss[0]


# --------------------------------- main --------------------------------------

if __name__ == "__main__":
    N, IN_DIM, LATENT, E = 16, 8, 32, 40

    key = jax.random.PRNGKey(0)
    ks = jax.random.split(key, 8)

    x = jax.random.normal(ks[0], (N, IN_DIM), jnp.float32)
    n_x = jax.random.normal(ks[1], (N, IN_DIM), jnp.float32)

    src = jax.random.randint(ks[2], (E,), 0, N)
    dst = jax.random.randint(ks[3], (E,), 0, N)
    dst = jnp.where(dst == src, (dst + 1) % N, dst)  # no explicit self-loops
    s_edge_index = jnp.stack([src, dst])

    src2 = jax.random.randint(ks[4], (E,), 0, N)
    dst2 = jax.random.randint(ks[5], (E,), 0, N)
    dst2 = jnp.where(dst2 == src2, (dst2 + 1) % N, dst2)
    sf_edge_index = jnp.stack([src2, dst2])

    params = init_params(ks[6], IN_DIM, LATENT)

    fwd = jax.jit(functools.partial(model_forward, params))
    hi, h, loss = fwd(x, n_x, s_edge_index, sf_edge_index, ks[7])
    jax.block_until_ready((hi, h, loss))

    assert hi.shape == (N, LATENT)
    assert h.shape == (N, IN_DIM)
    assert loss.shape == ()
    assert bool(jnp.isfinite(loss))
    print("KERNEL_OK")
</pallas_src>

<mosaic_0001>
module attributes {stable_mosaic.version = 11 : i64} {
  func.func @_fused_forward_kernel(%arg0: memref<48x48xf32, #tpu.memory_space<vmem>>, %arg1: memref<48x8xf32, #tpu.memory_space<vmem>>, %arg2: memref<20x32xf32, #tpu.memory_space<vmem>>, %arg3: memref<16x32xf32, #tpu.memory_space<vmem>>, %arg4: memref<16x8xf32, #tpu.memory_space<vmem>>, %arg5: memref<1xf32, #tpu.memory_space<smem>>) attributes {dimension_semantics = [], scalar_prefetch = 0 : i64, scratch_operands = 0 : i64, tpu.core_type = #tpu.core_type<tc>} {
    %c0 = arith.constant 0 : index
    %c0_0 = arith.constant 0 : index
    %0 = vector.load %arg0[%c0, %c0_0] : memref<48x48xf32, #tpu.memory_space<vmem>>, vector<48x48xf32>
    %c0_1 = arith.constant 0 : index
    %c0_2 = arith.constant 0 : index
    %1 = vector.load %arg1[%c0_1, %c0_2] : memref<48x8xf32, #tpu.memory_space<vmem>>, vector<48x8xf32>
    %c0_3 = arith.constant 0 : index
    %c0_4 = arith.constant 0 : index
    %2 = vector.load %arg2[%c0_3, %c0_4] : memref<20x32xf32, #tpu.memory_space<vmem>>, vector<8x32xf32>
    %c8 = arith.constant 8 : index
    %c0_5 = arith.constant 0 : index
    %3 = vector.load %arg2[%c8, %c0_5] : memref<20x32xf32, #tpu.memory_space<vmem>>, vector<8x32xf32>
    %c16 = arith.constant 16 : index
    %c0_6 = arith.constant 0 : index
    %4 = vector.load %arg2[%c16, %c0_6] : memref<20x32xf32, #tpu.memory_space<vmem>>, vector<4x32xf32>
    %5 = vector.extract_strided_slice %4 {offsets = [0, 0], sizes = [1, 32], strides = [1, 1]} : vector<4x32xf32> to vector<1x32xf32>
    %6 = vector.extract_strided_slice %4 {offsets = [1, 0], sizes = [1, 32], strides = [1, 1]} : vector<4x32xf32> to vector<1x32xf32>
    %7 = vector.extract_strided_slice %4 {offsets = [2, 0], sizes = [1, 32], strides = [1, 1]} : vector<4x32xf32> to vector<1x32xf32>
    %8 = vector.extract_strided_slice %4 {offsets = [3, 0], sizes = [1, 8], strides = [1, 1]} : vector<4x32xf32> to vector<1x8xf32>
    %cst = arith.constant dense<0.000000e+00> : vector<48x32xf32>
    %9 = tpu.matmul %1, %2, %cst {dimension_numbers = #tpu.dot_dimension_numbers<[1], [0], [0], [1], [0, 0, 1, 1], [], []>} : vector<48x8xf32>, vector<8x32xf32>, vector<48x32xf32> -> vector<48x32xf32>
    %cst_7 = arith.constant dense<0.000000e+00> : vector<48x32xf32>
    %10 = tpu.matmul %0, %9, %cst_7 {dimension_numbers = #tpu.dot_dimension_numbers<[1], [0], [0], [1], [0, 0, 1, 1], [], []>} : vector<48x48xf32>, vector<48x32xf32>, vector<48x32xf32> -> vector<48x32xf32>
    %11 = vector.broadcast %5 : vector<1x32xf32> to vector<48x32xf32>
    %12 = arith.addf %10, %11 : vector<48x32xf32>
    %13 = vector.extract_strided_slice %12 {offsets = [0, 0], sizes = [16, 32], strides = [1, 1]} : vector<48x32xf32> to vector<16x32xf32>
    %14 = vector.extract_strided_slice %12 {offsets = [16, 0], sizes = [16, 32], strides = [1, 1]} : vector<48x32xf32> to vector<16x32xf32>
    %15 = vector.extract_strided_slice %12 {offsets = [32, 0], sizes = [16, 32], strides = [1, 1]} : vector<48x32xf32> to vector<16x32xf32>
    %16 = vector.extract_strided_slice %0 {offsets = [0, 0], sizes = [16, 16], strides = [1, 1]} : vector<48x48xf32> to vector<16x16xf32>
    %cst_8 = arith.constant dense<0.000000e+00> : vector<16x8xf32>
    %17 = tpu.matmul %13, %3, %cst_8 {dimension_numbers = #tpu.dot_dimension_numbers<[1], [1], [0], [0], [0, 0, 1, 0], [], []>} : vector<16x32xf32>, vector<8x32xf32>, vector<16x8xf32> -> vector<16x8xf32>
    %cst_9 = arith.constant dense<0.000000e+00> : vector<16x8xf32>
    %18 = tpu.matmul %16, %17, %cst_9 {dimension_numbers = #tpu.dot_dimension_numbers<[1], [0], [0], [1], [0, 0, 1, 1], [], []>} : vector<16x16xf32>, vector<16x8xf32>, vector<16x8xf32> -> vector<16x8xf32>
    %19 = vector.broadcast %8 : vector<1x8xf32> to vector<16x8xf32>
    %20 = arith.addf %18, %19 : vector<16x8xf32>
    %21 = tpu.concatenate %13, %14, %15 in 1 : vector<16x32xf32>, vector<16x32xf32>, vector<16x32xf32> -> vector<16x96xf32>
    %22 = tpu.concatenate %6, %6, %6 in 1 : vector<1x32xf32>, vector<1x32xf32>, vector<1x32xf32> -> vector<1x96xf32>
    %23 = tpu.concatenate %7, %7, %7 in 1 : vector<1x32xf32>, vector<1x32xf32>, vector<1x32xf32> -> vector<1x96xf32>
    %cst_10 = arith.constant dense<0.000000e+00> : vector<96xf32>
    %24 = vector.multi_reduction <add>, %21, %cst_10 [0] : vector<16x96xf32> to vector<96xf32>
    %25 = vector.shape_cast %24 : vector<96xf32> to vector<1x96xf32>
    %cst_11 = arith.constant 6.250000e-02 : f32
    %26 = vector.broadcast %cst_11 : f32 to vector<1x96xf32>
    %27 = arith.mulf %25, %26 : vector<1x96xf32>
    %28 = arith.mulf %21, %21 : vector<16x96xf32>
    %cst_12 = arith.constant dense<0.000000e+00> : vector<96xf32>
    %29 = vector.multi_reduction <add>, %28, %cst_12 [0] : vector<16x96xf32> to vector<96xf32>
    %30 = vector.shape_cast %29 : vector<96xf32> to vector<1x96xf32>
    %cst_13 = arith.constant 6.250000e-02 : f32
    %31 = vector.broadcast %cst_13 : f32 to vector<1x96xf32>
    %32 = arith.mulf %30, %31 : vector<1x96xf32>
    %33 = arith.mulf %27, %27 : vector<1x96xf32>
    %34 = arith.subf %32, %33 : vector<1x96xf32>
    %cst_14 = arith.constant 9.99999974E-6 : f32
    %35 = vector.broadcast %cst_14 : f32 to vector<1x96xf32>
    %36 = arith.addf %34, %35 : vector<1x96xf32>
    %37 = math.rsqrt %36 : vector<1x96xf32>
    %38 = arith.mulf %37, %22 : vector<1x96xf32>
    %39 = arith.mulf %27, %38 : vector<1x96xf32>
    %40 = arith.subf %23, %39 : vector<1x96xf32>
    %41 = vector.broadcast %38 : vector<1x96xf32> to vector<16x96xf32>
    %42 = arith.mulf %21, %41 : vector<16x96xf32>
    %43 = vector.broadcast %40 : vector<1x96xf32> to vector<16x96xf32>
    %44 = arith.addf %42, %43 : vector<16x96xf32>
    %cst_15 = arith.constant 0.000000e+00 : f32
    %45 = vector.broadcast %cst_15 : f32 to vector<16x96xf32>
    %46 = arith.cmpf ogt, %44, %45 : vector<16x96xf32>
    %cst_16 = arith.constant 0.000000e+00 : f32
    %47 = vector.broadcast %cst_16 : f32 to vector<16x96xf32>
    %48 = arith.minimumf %44, %47 : vector<16x96xf32>
    %49 = math.exp %48 : vector<16x96xf32>
    %cst_17 = arith.constant 1.000000e+00 : f32
    %50 = vector.broadcast %cst_17 : f32 to vector<16x96xf32>
    %51 = arith.subf %49, %50 : vector<16x96xf32>
    %52 = arith.select %46, %44, %51 : vector<16x96xi1>, vector<16x96xf32>
    %53 = vector.extract_strided_slice %52 {offsets = [0, 0], sizes = [16, 32], strides = [1, 1]} : vector<16x96xf32> to vector<16x32xf32>
    %54 = vector.extract_strided_slice %52 {offsets = [0, 32], sizes = [16, 32], strides = [1, 1]} : vector<16x96xf32> to vector<16x32xf32>
    %55 = vector.extract_strided_slice %52 {offsets = [0, 64], sizes = [16, 32], strides = [1, 1]} : vector<16x96xf32> to vector<16x32xf32>
    %56 = vector.extract_strided_slice %1 {offsets = [0, 0], sizes = [16, 8], strides = [1, 1]} : vector<48x8xf32> to vector<16x8xf32>
    %57 = arith.subf %56, %20 : vector<16x8xf32>
    %58 = arith.mulf %57, %57 : vector<16x8xf32>
    %59 = vector.shape_cast %58 : vector<16x8xf32> to vector<1x16x8xf32>
    %cst_18 = arith.constant dense<0.000000e+00> : vector<1xf32>
    %60 = vector.multi_reduction <add>, %59, %cst_18 [1, 2] : vector<1x16x8xf32> to vector<1xf32>
    %61 = vector.shape_cast %60 : vector<1xf32> to vector<1x1x1xf32>
    %62 = vector.extract %61[0, 0, 0] : f32 from vector<1x1x1xf32>
    %cst_19 = arith.constant 7.812500e-03 : f32
    %63 = arith.mulf %62, %cst_19 : f32
    %64 = arith.mulf %53, %53 : vector<16x32xf32>
    %cst_20 = arith.constant dense<0.000000e+00> : vector<16xf32>
    %65 = vector.multi_reduction <add>, %64, %cst_20 [1] : vector<16x32xf32> to vector<16xf32>
    %66 = vector.shape_cast %65 : vector<16xf32> to vector<16x1xf32>
    %cst_21 = arith.constant 1.000000e-24 : f32
    %67 = vector.broadcast %cst_21 : f32 to vector<16x1xf32>
    %68 = arith.maximumf %66, %67 : vector<16x1xf32>
    %69 = math.rsqrt %68 : vector<16x1xf32>
    %70 = vector.broadcast %69 : vector<16x1xf32> to vector<16x32xf32>
    %71 = arith.mulf %53, %70 : vector<16x32xf32>
    %72 = arith.mulf %54, %54 : vector<16x32xf32>
    %cst_22 = arith.constant dense<0.000000e+00> : vector<16xf32>
    %73 = vector.multi_reduction <add>, %72, %cst_22 [1] : vector<16x32xf32> to vector<16xf32>
    %74 = vector.shape_cast %73 : vector<16xf32> to vector<16x1xf32>
    %cst_23 = arith.constant 1.000000e-24 : f32
    %75 = vector.broadcast %cst_23 : f32 to vector<16x1xf32>
    %76 = arith.maximumf %74, %75 : vector<16x1xf32>
    %77 = math.rsqrt %76 : vector<16x1xf32>
    %78 = vector.broadcast %77 : vector<16x1xf32> to vector<16x32xf32>
    %79 = arith.mulf %54, %78 : vector<16x32xf32>
    %80 = arith.mulf %55, %55 : vector<16x32xf32>
    %cst_24 = arith.constant dense<0.000000e+00> : vector<16xf32>
    %81 = vector.multi_reduction <add>, %80, %cst_24 [1] : vector<16x32xf32> to vector<16xf32>
    %82 = vector.shape_cast %81 : vector<16xf32> to vector<16x1xf32>
    %cst_25 = arith.constant 1.000000e-24 : f32
    %83 = vector.broadcast %cst_25 : f32 to vector<16x1xf32>
    %84 = arith.maximumf %82, %83 : vector<16x1xf32>
    %85 = math.rsqrt %84 : vector<16x1xf32>
    %86 = vector.broadcast %85 : vector<16x1xf32> to vector<16x32xf32>
    %87 = arith.mulf %55, %86 : vector<16x32xf32>
    %88 = arith.mulf %71, %79 : vector<16x32xf32>
    %cst_26 = arith.constant dense<0.000000e+00> : vector<16xf32>
    %89 = vector.multi_reduction <add>, %88, %cst_26 [1] : vector<16x32xf32> to vector<16xf32>
    %90 = vector.shape_cast %89 : vector<16xf32> to vector<16x1xf32>
    %cst_27 = arith.constant 2.000000e+01 : f32
    %91 = vector.broadcast %cst_27 : f32 to vector<16x1xf32>
    %92 = arith.mulf %90, %91 : vector<16x1xf32>
    %cst_28 = arith.constant dense<0.000000e+00> : vector<16x16xf32>
    %93 = tpu.matmul %71, %87, %cst_28 {dimension_numbers = #tpu.dot_dimension_numbers<[1], [1], [0], [0], [0, 0, 1, 0], [], []>} : vector<16x32xf32>, vector<16x32xf32>, vector<16x16xf32> -> vector<16x16xf32>
    %cst_29 = arith.constant 2.000000e+01 : f32
    %94 = vector.broadcast %cst_29 : f32 to vector<16x16xf32>
    %95 = arith.mulf %93, %94 : vector<16x16xf32>
    %cst_30 = arith.constant dense<0xFF800000> : vector<16xf32>
    %96 = vector.multi_reduction <maximumf>, %95, %cst_30 [1] : vector<16x16xf32> to vector<16xf32>
    %97 = vector.shape_cast %96 : vector<16xf32> to vector<16x1xf32>
    %98 = arith.maximumf %92, %97 : vector<16x1xf32>
    %99 = arith.subf %92, %98 : vector<16x1xf32>
    %100 = math.exp %99 : vector<16x1xf32>
    %101 = vector.broadcast %98 : vector<16x1xf32> to vector<16x16xf32>
    %102 = arith.subf %95, %101 : vector<16x16xf32>
    %103 = math.exp %102 : vector<16x16xf32>
    %cst_31 = arith.constant dense<0.000000e+00> : vector<16xf32>
    %104 = vector.multi_reduction <add>, %103, %cst_31 [1] : vector<16x16xf32> to vector<16xf32>
    %105 = vector.shape_cast %104 : vector<16xf32> to vector<16x1xf32>
    %106 = arith.addf %100, %105 : vector<16x1xf32>
    %107 = math.log %106 : vector<16x1xf32>
    %108 = arith.addf %98, %107 : vector<16x1xf32>
    %109 = arith.subf %108, %92 : vector<16x1xf32>
    %110 = vector.shape_cast %109 : vector<16x1xf32> to vector<1x16x1xf32>
    %cst_32 = arith.constant dense<0.000000e+00> : vector<1xf32>
    %111 = vector.multi_reduction <add>, %110, %cst_32 [1, 2] : vector<1x16x1xf32> to vector<1xf32>
    %112 = vector.shape_cast %111 : vector<1xf32> to vector<1x1x1xf32>
    %113 = vector.extract %112[0, 0, 0] : f32 from vector<1x1x1xf32>
    %cst_33 = arith.constant 6.250000e-02 : f32
    %114 = arith.mulf %113, %cst_33 : f32
    %c0_34 = arith.constant 0 : index
    %c0_35 = arith.constant 0 : index
    %115 = vector.load %arg3[%c0_34, %c0_35] : memref<16x32xf32, #tpu.memory_space<vmem>>, vector<16x32xf32>
    tpu.vector_store %arg3[%c0_34, %c0_35], %13 {strides = array<i32>} : memref<16x32xf32, #tpu.memory_space<vmem>>, vector<16x32xf32>,
    %c0_36 = arith.constant 0 : index
    %c0_37 = arith.constant 0 : index
    %116 = vector.load %arg4[%c0_36, %c0_37] : memref<16x8xf32, #tpu.memory_space<vmem>>, vector<16x8xf32>
    tpu.vector_store %arg4[%c0_36, %c0_37], %20 {strides = array<i32>} : memref<16x8xf32, #tpu.memory_space<vmem>>, vector<16x8xf32>,
    %117 = arith.addf %63, %114 : f32
    %c0_38 = arith.constant 0 : index
    %118 = memref.load %arg5[%c0_38] : memref<1xf32, #tpu.memory_space<smem>>
    memref.store %117, %arg5[%c0_38] : memref<1xf32, #tpu.memory_space<smem>>
    return
  }
}

</mosaic_0001>

<bundles_post_ra>
// kernel: model_forward.1
= control target key start
LH: loop header
LB: loop body
LE: loop exit
PB: predicated region body
PF: predicated region fallthrough
CT: control target
= control target key end

     0   :  { %11 = vsyncpa [#allocation3], 0  ;;  %vm34_vm0 = vcmask 64512   ;;  %s1217_s0 = inlined_call_operand.vmem [shape: f32[48,48], index: 0, kind: input, shape index: {}]   ;;  %s1218_s1 = inlined_call_operand.vmem [shape: f32[48,8], index: 1, kind: input, shape index: {}]   ;;  %s1219_s2 = inlined_call_operand.vmem [shape: f32[20,32], index: 2, kind: input, shape index: {}]   ;;  %s1220_s3 = inlined_call_operand.hbm [shape: f32[16,32], index: 3, kind: output, shape index: {0}]   ;;  %s1221_s4 = inlined_call_operand.vmem [shape: f32[16,8], index: 4, kind: output, shape index: {1}]   ;;  %s1222_s5 = inlined_call_operand.hbm [shape: f32[1], index: 5, kind: output, shape index: {2}]  }
   0x1   :  { %v31_v0 = vld [vmem:[%s1219_s2] sm:$0xff]  ;;  %v1054_v2 = vld [vmem:[%s1218_s1 + $0x8] sm:$0xff]  ;;  %v27_v3 = vld [vmem:[%s1218_s1 + $0x10] sm:$0xff] }
   0x2   :  { %v1049_v1 = vld [vmem:[%s1218_s1] sm:$0xff]  ;;  %845 = vmatprep.subr.mxu0 %v31_v0 }
   0x3   :  { %847 = vmatprep.mubr.msk.f32.mxu0 %vm34_vm0, %v1049_v1  ;;  %846 = vmatpush3.msra.mxu0 %v31_v0 }
   0x4   :  { %12 = vsyncpa [#allocation4], 0  ;;  %848 = vmatmul.mubr.msk.f32.vlgmr.msra.gmra.mrb[0].mxu0 %vm34_vm0, %v1054_v2  ;;  %v28_v4 = vld [vmem:[%s1218_s1 + $0x18] sm:$0xff]  ;;  %v29_v5 = vld [vmem:[%s1218_s1 + $0x20] sm:$0xff]  ;;  %vm152_vm1 = vcmask 392192   ;;  %v148_v22 = vlaneseq  ;;  %vm266_vm2 = vcmask 261120  }
   0x5   :  { %850 = vmatprep.mubr.msk.f32.mxu0 %vm34_vm0, %v27_v3  ;;  %v30_v6 = vld [vmem:[%s1218_s1 + $0x28] sm:$0xff]  ;;  %v21_v7 = vld [vmem:[%s1217_s0 + $0x10] sm:$0xff]  ;;  %v1083_v8 = vld [vmem:[%s1217_s0] sm:$0xff]  ;;  %vm453_vm3 = vcmask 523264   ;;  %vm465_vm4 = vcmask 785408   ;;  %s1008_s22 = smov 96  }
   0x6   :  { %871 = vmatprep.mubr.msk.f32.mxu1 %vm152_vm1, %v21_v7  ;;  %v22_v18 = vld [vmem:[%s1217_s0 + $0x18] sm:$0xff]  ;;  %v1093_v19 = vld [vmem:[%s1217_s0 + $0x8] sm:$0xff]  ;;  %v23_v20 = vld [vmem:[%s1217_s0 + $0x20] sm:$0xff]  ;;  %v1106_v23 = vshrl.u32 %v148_v22, 7  ;;  %vm355_vm8 = vcmask 130048   ;;  %vm738_vm9 = vcmask 7168  }
   0x7   :  { %v24_v21 = vld [vmem:[%s1217_s0 + $0x28] sm:$0xff]  ;;  %v1117_v26 = vld [vmem:[%s1219_s2 + $0x10] sm:$0xf]  ;;  %s1006_s0 = smov 32   ;;  %vm913_vm7 = vmpackc.low %vm266_vm2, %vm266_vm2 }
   0x8   :  { %851 = vmatmul.mubr.msk.f32.gmra.mrb[2].mxu0 %vm34_vm0, %v28_v4  ;;  %v32_v24 = vld [vmem:[%s1219_s2 + $0x8] sm:$0xff]  ;;  %v150_v25 = vsub.s32 0, %v1106_v23  ;;  %s1007_s2 = smov 64  }
   0x9   :  { %853 = vmatprep.mubr.msk.f32.mxu0 %vm34_vm0, %v29_v5 }
   0xa   :  { %v151_v27 = vrot.slane %v1117_v26, %v150_v25 }
   0xc   :  { %854 = vmatmul.mubr.msk.f32.gmra.mrb[4].mxu0 %vm34_vm0, %v30_v6 }
   0xd   :  { %868 = vmatprep.mubr.msk.f32.mxu0 %vm152_vm1, %v1083_v8 }
  0xd7   :  { %v849_v9 = vpop.f32.mrb[0].mxu0 }
  0xd8   :  { %v119_v10 = vpop.f32.mrb[1].mxu0 }
  0xd9   :  { %v896_v11 = vpack.c.bf16 %v849_v9, %v119_v10 }
  0xdb   :  { %v852_v12 = vpop.f32.mrb[2].mxu0  ;;  %897 = vmatprep.subr.bf16.mxu0 %v896_v11  ;;  %918 = vmatprep.subr.bf16.mxu1 %v896_v11 }
  0xdc   :  { %v129_v13 = vpop.f32.mrb[3].mxu0  ;;  %899 = vmatpush3.bf16.msra.mxu0 %v896_v11  ;;  %921 = vmatpush3.bf16.msra.mxu1 %v896_v11 }
  0xdd   :  { %v900_v14 = vpack.c.bf16 %v852_v12, %v129_v13 }
  0xdf   :  { %v855_v15 = vpop.f32.mrb[4].mxu0  ;;  %901 = vmatprep.subr.bf16.mxu0 %v900_v14  ;;  %919 = vmatprep.subr.bf16.mxu1 %v900_v14 }
  0xe0   :  { %v139_v16 = vpop.f32.mrb[5].mxu0  ;;  %903 = vmatpush3.bf16.msra.mxu0 %v900_v14  ;;  %922 = vmatpush3.bf16.msra.mxu1 %v900_v14 }
  0xe1   :  { %v904_v17 = vpack.c.bf16 %v855_v15, %v139_v16 }
  0xe3   :  { %905 = vmatprep.subr.bf16.mxu0 %v904_v17  ;;  %920 = vmatprep.subr.bf16.mxu1 %v904_v17 }
  0xe4   :  { %907 = vmatpush3.bf16.msra.mxu0 %v904_v17  ;;  %923 = vmatpush3.bf16.msra.mxu1 %v904_v17  ;;  %v500_v17 = vsub.s32 1, %v1106_v23 }
  0xe5   :  { %877 = vmatprep.subr.msk.mxu0 %vm266_vm2, %v32_v24 }
  0xe7   :  { %872 = vmatmul.mubr.msk.f32.vlgmr.msra.gmra.mrb[0].mxu1 %vm152_vm1, %v22_v18  ;;  %869 = vmatmul.mubr.msk.f32.vlgmr.msra.gmra.mrb[6].mxu0 %vm152_vm1, %v1093_v19 }
  0xe8   :  { %874 = vmatprep.mubr.msk.f32.mxu1 %vm152_vm1, %v23_v20 }
  0xeb   :  { %875 = vmatmul.mubr.msk.f32.gmra.mrb[2].mxu1 %vm152_vm1, %v24_v21  ;;  %v506_v21 = vsub.s32 2, %v1106_v23 }
  0xed   :  { %878 = vmatpush3.xpose.msk.msra.mxu0 %vm266_vm2, %v32_v24 }
 0x1ba   :  { %v873_v28 = vpop.f32.mrb[0].mxu1  ;;  %v870_v29 = vpop.f32.mrb[6].mxu0 }
 0x1bb   :  { %v247_v30 = vpop.f32.mrb[1].mxu1  ;;  %v243_v31 = vadd.f32 %v870_v29, %v151_v27  ;;  %v237_v32 = vpop.f32.mrb[7].mxu0  ;;  %v253_v37 = vadd.f32 %v873_v28, %v151_v27 }
 0x1bc   :  { %v248_v33 = vadd.f32 %v247_v30, %v151_v27  ;;  %v238_v34 = vadd.f32 %v237_v32, %v151_v27 }
 0x1bd   :  { %753 = vst.msk [vmem:[#allocation2 + $0x8] sm:$0xff] %vm266_vm2, %v243_v31 }
 0x1be   :  { %v876_v35 = vpop.f32.mrb[2].mxu1  ;;  %437 = vrot.lane.b32.xlu0 %v248_v33, %s1006_s0  ;;  %752 = vst.msk [vmem:[#allocation2] sm:$0xff] %vm266_vm2, %v238_v34  ;;  %879 = vmatprep.mubr.msk.f32.mxu0 %vm266_vm2, %v238_v34 }
 0x1bf   :  { %v257_v36 = vpop.f32.mrb[3].mxu1  ;;  %880 = vmatmul.mubr.msk.f32.vlgmr.msra.gmra.mrb[8].mxu0 %vm266_vm2, %v243_v31  ;;  %v263_v39 = vadd.f32 %v876_v35, %v151_v27 }
 0x1c0   :  { %v258_v38 = vadd.f32 %v257_v36, %v151_v27  ;;  %886 = vmatprep.mubr.msk.f32.mxu0 %vm355_vm8, %v1083_v8 }
 0x1c2   :  { %445 = vrot.lane.b32.xlu1 %v258_v38, %s1007_s2  ;;  %439 = vrot.lane.b32.xlu0 %v253_v37, %s1006_s0 }
 0x1c6   :  { %447 = vrot.lane.b32.xlu1 %v263_v39, %s1007_s2  ;;  %457 = vrot.lane.b32.xlu0 %v1117_v26, %s1006_s0 }
 0x1ca   :  { %460 = vrot.lane.b32.xlu1 %v1117_v26, %s1007_s2 }
 0x230   :  { %v438_v40 = vpop.permute.xlu0 %437 }
 0x231   :  { %v451_v41 = vsel %vm266_vm2, %v238_v34, %v438_v40 }
 0x234   :  { %v446_v42 = vpop.permute.xlu1 %445  ;;  %v440_v44 = vpop.permute.xlu0 %439 }
 0x235   :  { %v454_v43 = vsel %vm453_vm3, %v451_v41, %v446_v42  ;;  %v452_v46 = vsel %vm266_vm2, %v243_v31, %v440_v44 }
 0x236   :  { %v476_v45 = vmul.f32 %v454_v43, %v454_v43  ;;  %v466_v49 = vsel %vm465_vm4, %v454_v43, 0.0 }
 0x238   :  { %v448_v47 = vpop.permute.xlu1 %447  ;;  %v478_v53 = vsel %vm465_vm4, %v476_v45, 0.0  ;;  %v458_v12 = vpop.permute.xlu0 %457 }
 0x239   :  { %v455_v48 = vsel %vm453_vm3, %v452_v46, %v448_v47  ;;  %v463_v13 = vsel %vm266_vm2, %v1117_v26, %v458_v12 }
 0x23a   :  { %v467_v50 = vsel %vm465_vm4, %v455_v48, 0.0  ;;  %v477_v51 = vmul.f32 %v455_v48, %v455_v48 }
 0x23b   :  { %v468_v52 = vadd.f32 %v467_v50, %v466_v49 }
 0x23c   :  { %v479_v54 = vsel %vm465_vm4, %v477_v51, 0.0  ;;  %v461_v14 = vpop.permute.xlu1 %460 }
 0x23d   :  { %v469_v55 = vrot.slane %v468_v52, 4  ;;  %v480_v56 = vadd.f32 %v479_v54, %v478_v53  ;;  %v464_v15 = vsel %vm453_vm3, %v463_v13, %v461_v14 }
 0x23f   :  { %v470_v57 = vadd.f32 %v469_v55, %v468_v52  ;;  %v481_v58 = vrot.slane %v480_v56, 4 }
 0x241   :  { %v471_v59 = vrot.slane %v470_v57, 2  ;;  %v482_v60 = vadd.f32 %v481_v58, %v480_v56 }
 0x243   :  { %v472_v61 = vadd.f32 %v471_v59, %v470_v57  ;;  %v483_v62 = vrot.slane %v482_v60, 2 }
 0x245   :  { %v484_v63 = vadd.f32 %v483_v62, %v482_v60  ;;  %v473_v0 = vrot.slane %v472_v61, 1 }
 0x247   :  { %v485_v3 = vrot.slane %v484_v63, 1  ;;  %v474_v4 = vadd.f32 %v473_v0, %v472_v61 }
 0x249   :  { %v486_v5 = vadd.f32 %v485_v3, %v484_v63  ;;  %v475_v6 = vmul.f32 0.0625, %v474_v4 }
 0x24b   :  { %v487_v7 = vmul.f32 0.0625, %v486_v5  ;;  %v488_v9 = vmul.f32 %v475_v6, %v475_v6 }
 0x24d   :  { %v489_v10 = vsub.f32 %v487_v7, %v488_v9 }
 0x24f   :  { %v490_v11 = vadd.f32 1e-05, %v489_v10 }
 0x251   :  { %940 = vrsqrt.f32 %v490_v11 }
 0x25b   :  { %v941_v16 = vpop.eup %940 }
 0x25c   :  { %v492_v18 = vmul.f32 %v941_v16, %v464_v15 }
 0x25e   :  { %v493_v20 = vmul.f32 %v492_v18, %v475_v6  ;;  %v501_v24 = vrot.slane %v492_v18, %v500_v17 }
 0x260   :  { %v495_v22 = vrot.slane %v493_v20, 7  ;;  %v502_v27 = vmul.f32 %v501_v24, %v454_v43  ;;  %v503_v28 = vmul.f32 %v501_v24, %v455_v48 }
 0x262   :  { %v497_v25 = vsub.f32 %v464_v15, %v495_v22 }
 0x264   :  { %v507_v29 = vrot.slane %v497_v25, %v506_v21 }
 0x266   :  { %v508_v30 = vadd.f32 %v507_v29, %v502_v27  ;;  %v509_v31 = vadd.f32 %v507_v29, %v503_v28 }
 0x268   :  { %v512_v32 = vmin.f32 %v508_v30, 0.0  ;;  %v513_v33 = vmin.f32 %v509_v31, 0.0  ;;  %vm510_vm5 = vcmp.gt.f32.partialorder %v508_v30, 0.0  ;;  %vm511_vm6 = vcmp.gt.f32.partialorder %v509_v31, 0.0 }
 0x26a   :  { %v514_v34 = vmul.f32 1.442695, %v512_v32  ;;  %v516_v35 = vmul.f32 1.442695, %v513_v33 }
 0x26c   :  { %942 = vpow2.f32 %v514_v34 }
 0x26d   :  { %944 = vpow2.f32 %v516_v35 }
 0x276   :  { %v943_v36 = vpop.eup %942 }
 0x277   :  { %v945_v37 = vpop.eup %944  ;;  %v809_v38 = vadd.f32 -1.0, %v943_v36 }
 0x278   :  { %v810_v39 = vadd.f32 -1.0, %v945_v37 }
 0x279   :  { %v1138_v40 = vsel %vm510_vm5, %v508_v30, %v809_v38 }
 0x27a   :  { %v1140_v41 = vsel %vm511_vm6, %v509_v31, %v810_v39  ;;  %v539_v42 = vmul.f32 %v1138_v40, %v1138_v40 }
 0x27b   :  { %v540_v43 = vmul.f32 %v1140_v41, %v1140_v41 }
 0x27c   :  { %573 = vrot.lane.b32.xlu0 %v539_v42, %s1007_s2  ;;  %v541_v51 = vsel %vm266_vm2, %v539_v42, 0.0 }
 0x27d   :  { %575 = vrot.lane.b32.xlu1 %v540_v43, %s1007_s2  ;;  %v544_v52 = vsel %vm266_vm2, %v540_v43, 0.0 }
 0x292   :  { %v881_v44 = vpop.f32.mrb[8].mxu0 }
 0x293   :  { %v342_v45 = vpop.f32.mrb[9].mxu0 }
 0x294   :  { %v908_v46 = vpack.c.bf16 %v881_v44, %v342_v45 }
 0x296   :  { %909 = vmatprep.subr.bf16.mxu0 %v908_v46 }
 0x297   :  { %911 = vmatpush3.bf16.msra.mxu0 %v908_v46 }
 0x29a   :  { %887 = vmatmul.mubr.msk.f32.vlgmr.msra.gmra.mrb[10].mxu0 %vm355_vm8, %v1093_v19 }
 0x2ee   :  { %v574_v47 = vpop.permute.xlu0 %573 }
 0x2ef   :  { %v576_v48 = vpop.permute.xlu1 %575  ;;  %v579_v49 = vsel %vm266_vm2, %v574_v47, 0.0 }
 0x2f0   :  { %v582_v50 = vsel %vm266_vm2, %v576_v48, 0.0  ;;  %580 = vadd.xlane.f32.xlu0 %v579_v49 }
 0x2f1   :  { %583 = vadd.xlane.f32.xlu1 %v582_v50 }
 0x2f4   :  { %542 = vadd.xlane.f32.xlu0 %v541_v51 }
 0x2f8   :  { %545 = vadd.xlane.f32.xlu0 %v544_v52 }
 0x30e   :  { %555 = vrot.lane.b32.xlu0 %v539_v42, %s1008_s22 }
 0x37d   :  { %v581_v53 = vpop.xlane.xlu0 %580 }
 0x37e   :  { %v584_v54 = vpop.xlane.xlu1 %583  ;;  %v585_v55 = vmax.f32 %v581_v53, 1e-24 }
 0x37f   :  { %v586_v56 = vmax.f32 %v584_v54, 1e-24  ;;  %v353_v54 = vsub.s32 3, %v1106_v23 }
 0x380   :  { %946 = vrsqrt.f32 %v585_v55 }
 0x381   :  { %948 = vrsqrt.f32 %v586_v56  ;;  %v543_v57 = vpop.xlane.xlu0 %542  ;;  %v354_v55 = vrot.slane %v1117_v26, %v353_v54  ;;  %v888_v56 = vpop.f32.mrb[10].mxu0 }
 0x382   :  { %v547_v58 = vmax.f32 %v543_v57, 1e-24  ;;  %v426_v57 = vpop.f32.mrb[11].mxu0 }
 0x384   :  { %950 = vrsqrt.f32 %v547_v58  ;;  %v432_v58 = vadd.f32 %v888_v56, %v354_v55 }
 0x385   :  { %v546_v4 = vpop.xlane.xlu0 %545 }
 0x386   :  { %v548_v7 = vmax.f32 %v546_v4, 1e-24  ;;  %755 = vst.msk [vmem:[%s1221_s4 + $0x8] sm:$0xff] %vm34_vm0, %v432_v58 }
 0x388   :  { %952 = vrsqrt.f32 %v548_v7 }
 0x389   :  { %v556_v5 = vpop.permute.xlu0 %555 }
 0x38a   :  { %v947_v59 = vpop.eup %946  ;;  %v561_v6 = vsel %vm266_vm2, %v556_v5, 0.0 }
 0x38b   :  { %v949_v60 = vpop.eup %948  ;;  %v589_v61 = vmul.f32 %v947_v59, %v1138_v40  ;;  %v427_v59 = vadd.f32 %v426_v57, %v354_v55 }
 0x38c   :  { %v590_v62 = vmul.f32 %v949_v60, %v1140_v41  ;;  %v523_v60 = vsub.f32 %v1054_v2, %v432_v58 }
 0x38d   :  { %754 = vst.msk [vmem:[%s1221_s4] sm:$0xff] %vm34_vm0, %v427_v59  ;;  %s1009_s4 = smov [#allocation2]  }
 0x38e   :  { %v951_v63 = vpop.eup %950  ;;  %v935_v0 = vpack.i.bf16 %v590_v62, %v589_v61  ;;  %v522_v61 = vsub.f32 %v1049_v1, %v427_v59  ;;  %v525_v23 = vmul.f32 %v523_v60, %v523_v60  ;;  %s764_s27 = sshll.u32 %s1009_s4, 4  ;;  %s765_s27 = int_to_ptr.vmem [resolvable:$true] %s764_s27 }
 0x38f   :  { %v551_v3 = vmul.f32 %v951_v63, %v1138_v40  ;;  %s970_s28 = scalar_lea.vmem %s765_s27, 256  ;;  %p975_p1 = scmp.lt.s32.totalorder %s765_s27, %s765_s27 }
 0x390   :  { %936 = vrot.lane.b32.xlu1 %v935_v0, %s1007_s2  ;;  %v524_v26 = vmul.f32 %v522_v61, %v522_v61  ;;  %v527_v63 = vsel %vm34_vm0, %v525_v23, 0.0  ;;  %p971_p0 = scmp.ne.s32.totalorder %s765_s27, %s970_s28  ;;  %p976_p2 = scmp.lt.s32.totalorder %s970_s28, %s970_s28 }
 0x391   :  { %893 = vmatprep.mubr.msk.f32.mxu1 %vm266_vm2, %v551_v3 }
 0x392   :  { %v953_v15 = vpop.eup %952  ;;  %v526_v62 = vsel %vm34_vm0, %v524_v26, 0.0  ;;  %p977_p3 = por %p976_p2, %p975_p1 }
 0x393   :  { %v552_v16 = vmul.f32 %v953_v15, %v1140_v41  ;;  %v528_v0 = vadd.f32 %v527_v63, %v526_v62 }
 0x394   :  { %557 = vrot.lane.b32.xlu1 %v540_v43, %s1008_s22  ;;  %p978_p4 = pnand %p977_p3, %p971_p0 }
 0x3b8   :  { %562 = vadd.xlane.f32.xlu1 %v561_v6 }
 0x402   :  { %v937_v9 = vpop.permute.xlu1 %936 }
 0x403   :  { %v939_v10 = vunpack.i.h.bf16 %v937_v9  ;;  %v938_v11 = vunpack.i.l.bf16 %v937_v9 }
 0x405   :  { %v912_v12 = vpack.c.bf16 %v939_v10, %v938_v11 }
 0x406   :  { %v558_v13 = vpop.permute.xlu1 %557 }
 0x407   :  { %914 = vmatprep.subr.msk.bf16.mxu1 %vm913_vm7, %v912_v12  ;;  %v564_v14 = vsel %vm266_vm2, %v558_v13, 0.0 }
 0x408   :  { %917 = vmatpush3.bf16.xpose.msk.msra.mxu1 %vm913_vm7, %v912_v12  ;;  %565 = vadd.xlane.f32.xlu0 %v564_v14 }
 0x40f   :  { %894 = vmatmul.mubr.msk.f32.vlgmr.msra.gmra.mrb[4].mxu1 %vm266_vm2, %v552_v16 }
 0x445   :  { %v563_v17 = vpop.xlane.xlu1 %562 }
 0x446   :  { %v567_v18 = vmax.f32 %v563_v17, 1e-24 }
 0x448   :  { %954 = vrsqrt.f32 %v567_v18 }
 0x452   :  { %v955_v20 = vpop.eup %954 }
 0x453   :  { %v571_v21 = vmul.f32 %v955_v20, %v1138_v40 }
 0x455   :  { %593 = vrot.lane.b32.xlu0 %v571_v21, %s1008_s22 }
 0x495   :  { %v566_v22 = vpop.xlane.xlu0 %565 }
 0x496   :  { %v568_v24 = vmax.f32 %v566_v22, 1e-24 }
 0x498   :  { %956 = vrsqrt.f32 %v568_v24 }
 0x4a2   :  { %v957_v25 = vpop.eup %956 }
 0x4a3   :  { %v572_v27 = vmul.f32 %v957_v25, %v1140_v41 }
 0x4a5   :  { %595 = vrot.lane.b32.xlu1 %v572_v27, %s1008_s22 }
 0x4c7   :  { %v594_v28 = vpop.permute.xlu0 %593 }
 0x4c8   :  { %v599_v29 = vmul.f32 %v594_v28, %v551_v3 }
 0x4ca   :  { %v601_v30 = vsel %vm266_vm2, %v599_v29, 0.0 }
 0x4cb   :  { %602 = vadd.xlane.f32.xlu1 %v601_v30 }
 0x4e2   :  { %v895_v31 = vpop.f32.mrb[4].mxu1 }
 0x4e3   :  { %v701_v32 = vmul.f32 20.0, %v895_v31  ;;  %v691_v33 = vpop.f32.mrb[5].mxu1 }
 0x4e4   :  { %v700_v35 = vmul.f32 20.0, %v691_v33 }
 0x4e5   :  { %v705_v8 = vsel %vm355_vm8, %v701_v32, -inf }
 0x4e6   :  { %706 = vmax.xlane.f32.xlu1 %v705_v8  ;;  %v702_v37 = vsel %vm355_vm8, %v700_v35, -inf }
 0x517   :  { %v596_v19 = vpop.permute.xlu1 %595 }
 0x518   :  { %v600_v34 = vmul.f32 %v596_v19, %v552_v16 }
 0x51a   :  { %v604_v36 = vsel %vm266_vm2, %v600_v34, 0.0 }
 0x51b   :  { %605 = vadd.xlane.f32.xlu0 %v604_v36 }
 0x51f   :  { %703 = vmax.xlane.f32.xlu0 %v702_v37 }
 0x558   :  { %v603_v38 = vpop.xlane.xlu1 %602 }
 0x559   :  { %v607_v42 = vmul.f32 20.0, %v603_v38 }
 0x573   :  { %v707_v41 = vpop.xlane.xlu1 %706 }
 0x5a8   :  { %v606_v39 = vpop.xlane.xlu0 %605 }
 0x5a9   :  { %v608_v40 = vmul.f32 20.0, %v606_v39 }
 0x5ab   :  { %v709_v43 = vmax.f32 %v608_v40, %v707_v41 }
 0x5ac   :  { %v704_v44 = vpop.xlane.xlu0 %703 }
 0x5ad   :  { %v717_v45 = vsub.f32 %v701_v32, %v709_v43  ;;  %v708_v46 = vmax.f32 %v607_v42, %v704_v44  ;;  %v711_v2 = vsub.f32 %v608_v40, %v709_v43 }
 0x5af   :  { %v720_v47 = vmul.f32 1.442695, %v717_v45  ;;  %v716_v48 = vsub.f32 %v700_v35, %v708_v46  ;;  %v710_v3 = vsub.f32 %v607_v42, %v708_v46  ;;  %v714_v4 = vmul.f32 1.442695, %v711_v2 }
 0x5b1   :  { %v718_v49 = vmul.f32 1.442695, %v716_v48  ;;  %958 = vpow2.f32 %v720_v47  ;;  %v712_v5 = vmul.f32 1.442695, %v710_v3 }
 0x5b3   :  { %960 = vpow2.f32 %v718_v49 }
 0x5b4   :  { %962 = vpow2.f32 %v714_v4 }
 0x5b5   :  { %964 = vpow2.f32 %v712_v5 }
 0x5bb   :  { %v959_v50 = vpop.eup %958 }
 0x5bc   :  { %v725_v51 = vsel %vm355_vm8, %v959_v50, 0.0 }
 0x5bd   :  { %v961_v52 = vpop.eup %960  ;;  %726 = vadd.xlane.f32.xlu1 %v725_v51 }
 0x5be   :  { %v722_v53 = vsel %vm355_vm8, %v961_v52, 0.0  ;;  %v963_v1 = vpop.eup %962 }
 0x5bf   :  { %723 = vadd.xlane.f32.xlu0 %v722_v53  ;;  %v965_v9 = vpop.eup %964 }
 0x5c3   :  { %529 = vadd.xlane.f32.xlu0 %v528_v0 }
 0x64a   :  { %v727_v6 = vpop.xlane.xlu1 %726 }
 0x64b   :  { %v729_v7 = vadd.f32 %v963_v1, %v727_v6 }
 0x64c   :  { %v724_v10 = vpop.xlane.xlu0 %723 }
 0x64d   :  { %966 = vlog2.f32 %v729_v7  ;;  %v728_v11 = vadd.f32 %v965_v9, %v724_v10 }
 0x64f   :  { %968 = vlog2.f32 %v728_v11 }
 0x650   :  { %v530_v25 = vpop.xlane.xlu0 %529 }
 0x651   :  { %v531_v27 = vrot.slane %v530_v25, 4 }
 0x653   :  { %v532_v28 = vadd.f32 %v531_v27, %v530_v25 }
 0x655   :  { %v533_v29 = vrot.slane %v532_v28, 2 }
 0x657   :  { %v967_v12 = vpop.eup %966  ;;  %v534_v30 = vadd.f32 %v533_v29, %v532_v28 }
 0x658   :  { %v733_v13 = vmul.f32 0.6931472, %v967_v12 }
 0x659   :  { %v969_v14 = vpop.eup %968  ;;  %v535_v31 = vrot.slane %v534_v30, 1 }
 0x65a   :  { %v735_v15 = vadd.f32 %v733_v13, %v709_v43  ;;  %v731_v16 = vmul.f32 0.6931472, %v969_v14 }
 0x65b   :  { %v536_v32 = vadd.f32 %v535_v31, %v534_v30 }
 0x65c   :  { %v734_v17 = vadd.f32 %v731_v16, %v708_v46  ;;  %v737_v18 = vsub.f32 %v735_v15, %v608_v40 }
 0x65d   :  { %924 = vpush %v536_v32 }
 0x65e   :  { %v736_v20 = vsub.f32 %v734_v17, %v607_v42  ;;  %v740_v22 = vsel %vm738_vm9, %v737_v18, 0.0 }
 0x660   :  { %v739_v21 = vsel %vm738_vm9, %v736_v20, 0.0 }
 0x661   :  { %v741_v24 = vadd.f32 %v740_v22, %v739_v21 }
 0x663   :  { %742 = vadd.xlane.f32.xlu1 %v741_v24 }
 0x664   :  { %981 = shalt.err (!%p978_p4)
}
 0x665   :  { %s982_s6 = scalar_lea.hbm %s1220_s3, 256 }
 0x666   :  { %p983_p5 = scmp.ne.s32.totalorder %s1220_s3, %s982_s6  ;;  %p986_p6 = scmp.lt.u32.totalorder %s982_s6, %s1220_s3 }
 0x668   :  { %p988_p7 = pnand %p986_p6, %p983_p5 }
 0x66a   :  { %991 = shalt.err (!%p988_p7)
}
 0x66b   :  { %s1010_s1 = smov 128   ;;  %s1011_s11 = smov 8  }
 0x66c   :  { %770 = dma.vmem_to_hbm [thread:$0]  %s765_s27, 256, %s1220_s3, [#allocation3], %s1010_s1, %s1010_s1, %s1011_s11  }
 0x66d   :  { %s992_s21 = scalar_lea.hbm %s1222_s5, 16 }
 0x66e   :  { %p993_p8 = scmp.ne.s32.totalorder %s1222_s5, %s992_s21  ;;  %p996_p9 = scmp.lt.u32.totalorder %s992_s21, %s1222_s5 }
 0x670   :  { %p998_p10 = pnand %p996_p9, %p993_p8 }
 0x68e   :  { %s925_s14 = spop %924 }
 0x68f   :  { %s538_s15 = smul.f32 0.0078125, %s925_s14 }
 0x6f0   :  { %v743_v33 = vpop.xlane.xlu1 %742 }
 0x6f1   :  { %v744_v8 = vrot.slane %v743_v33, 4 }
 0x6f3   :  { %v745_v19 = vadd.f32 %v744_v8, %v743_v33 }
 0x6f5   :  { %v746_v34 = vrot.slane %v745_v19, 2 }
 0x6f7   :  { %v747_v35 = vadd.f32 %v746_v34, %v745_v19 }
 0x6f9   :  { %v748_v36 = vrot.slane %v747_v35, 1 }
 0x6fb   :  { %v749_v37 = vadd.f32 %v748_v36, %v747_v35 }
 0x6fd   :  { %926 = vpush %v749_v37 }
 0x72e   :  { %s927_s16 = spop %926 }
 0x72f   :  { %s751_s17 = smul.f32 0.0625, %s927_s16 }
 0x731   :  { %s756_s18 = sadd.f32 %s751_s17, %s538_s15 }
 0x733   :  { %758 = sst [smem:[#allocation5]] %s756_s18 }
 0x734   :  { %1001 = shalt.err (!%p998_p10)
}
 0x735   :  { %s1012_s23 = smov [#allocation5]  }
 0x736   :  { %780 = dma.smem_to_hbm %s1012_s23, 16, %s1222_s5, [#allocation4]  }
 0x737   :  { %1002 = dma.done.wait [#allocation3], 256  }
 0x738   :  { %1003 = vsyncadd [#allocation3], 4294967040 }
 0x739   :  { %1004 = dma.done.wait [#allocation4], 16  }
 0x73a   :  { %1005 = vsyncadd [#allocation4], 4294967280 }
 0x73b   :  { %789 = sfence }
 0x73c   :  { %790 = vsyncpa [#allocation3], 1 }
 0x73d   :  { %791 = vsyncpa [#allocation4], 1 }

</bundles_post_ra>
